<compile_context>
chip_gen: v6e
topology: v6e:2x2x1
jax: 0.10.0
libtpu: 0.0.40
codegen_flags: <defaults>
</compile_context>

<pallas_src>
import functools

import jax
import jax.numpy as jnp
from jax import lax
from jax.experimental import pallas as pl
from jax.experimental.pallas import tpu as pltpu


def _vmem_limit_bytes():
    # Budget against the chip's physical VMEM (64 MiB on v7x, 128 MiB v5e/v6e).
    try:
        cap = int(pltpu.get_tpu_info().vmem_capacity_bytes)
        return int(max(48 * 1024 * 1024,
                       min(cap - 8 * 1024 * 1024, 100 * 1024 * 1024)))
    except Exception:
        return 48 * 1024 * 1024


_VMEM_LIMIT = _vmem_limit_bytes()


def _cparams(semantics):
    return pltpu.CompilerParams(dimension_semantics=semantics,
                                vmem_limit_bytes=_VMEM_LIMIT)


def _rows(n, fn):
    """Run fn(r) for r = 0..n-1 inside a kernel (ref side effects allowed)."""
    def body(r, carry):
        fn(r)
        return carry
    lax.fori_loop(0, n, body, 0)


def _acc_taps(read_tap, w_ref, wo, cout):
    """Accumulate the 9 (dy, dx) taps of a 3x3 conv for one output row.

    read_tap(dy, dx) returns the (wo, cin) f32 input slice for that tap; the
    dot runs in bf16 on the MXU with an f32 accumulator."""
    acc = jnp.zeros((wo, cout), jnp.float32)
    for t in range(9):
        dy, dx = t // 3, t % 3
        lhs = read_tap(dy, dx).astype(jnp.bfloat16)
        acc = acc + jnp.dot(lhs, w_ref[t], preferred_element_type=jnp.float32)
    return acc


# ----------------------------------------------------------------------------
# Kernels
# ----------------------------------------------------------------------------
def _stem_kernel(x_ref, w_ref, s_ref, b_ref, o_ref, xp_ref, *, H, W, cout):
    # x_ref: (H, W, Cin)   o_ref: (H, W, cout)   xp_ref: (H+2, W+2, Cin)
    xp_ref[...] = jnp.zeros_like(xp_ref)

    def copy_row(r):
        xp_ref[r + 1, pl.ds(1, W), :] = x_ref[r]
    _rows(H, copy_row)

    def out_row(r):
        acc = _acc_taps(lambda dy, dx: xp_ref[r + dy, pl.ds(dx, W), :],
                        w_ref, W, cout)
        o_ref[r] = jnp.maximum(acc * s_ref[...] + b_ref[...], 0.0)
    _rows(H, out_row)


def _block_s1_kernel(x_ref, w1_ref, s1_ref, b1_ref, w2_ref, s2_ref, b2_ref,
                     o_ref, xp_ref, yp_ref, *, H, W, cout):
    # Stride-1 BasicBlock (identity shortcut), fully fused:
    #   conv1(3x3) + bn1 + relu  ->  VMEM scratch yp (padded)
    #   conv2(3x3) + bn2 + x + relu -> output
    xp_ref[...] = jnp.zeros_like(xp_ref)
    yp_ref[...] = jnp.zeros_like(yp_ref)

    def copy_row(r):
        xp_ref[r + 1, pl.ds(1, W), :] = x_ref[r]
    _rows(H, copy_row)

    def conv1_row(r):
        acc = _acc_taps(lambda dy, dx: xp_ref[r + dy, pl.ds(dx, W), :],
                        w1_ref, W, cout)
        yp_ref[r + 1, pl.ds(1, W), :] = jnp.maximum(
            acc * s1_ref[...] + b1_ref[...], 0.0)
    _rows(H, conv1_row)

    def conv2_row(r):
        acc = _acc_taps(lambda dy, dx: yp_ref[r + dy, pl.ds(dx, W), :],
                        w2_ref, W, cout)
        acc = acc * s2_ref[...] + b2_ref[...] + x_ref[r]   # identity shortcut
        o_ref[r] = jnp.maximum(acc, 0.0)
    _rows(H, conv2_row)


def _block_down_kernel(x_ref, w1_ref, s1_ref, b1_ref, w2_ref, s2_ref, b2_ref,
                       wd_ref, sd_ref, bd_ref, o_ref, xp_ref, yp_ref,
                       *, H, W, cout):
    # Downsampling BasicBlock (conv1 stride 2, fused 1x1/s2 + BN shortcut).
    # x_ref: (2, H, W//2, C) -- width split into (even, odd) column planes.
    # xp_ref scratch: (2, H+2, W//2+1, C) zero-padded input in parity layout:
    #   xp[p, hp, k, :] == x_pad[hp, 2*k + p, :]
    Ho, Wo = H // 2, W // 2
    W2 = W // 2
    xp_ref[...] = jnp.zeros_like(xp_ref)
    yp_ref[...] = jnp.zeros_like(yp_ref)

    def copy_row(h):
        # x_pad[h+1, 2k+1] = x[h, 2k]   -> parity 1, index k
        xp_ref[1, h + 1, pl.ds(0, W2), :] = x_ref[0, h]
        # x_pad[h+1, 2k+2] = x[h, 2k+1] -> parity 0, index k+1
        xp_ref[0, h + 1, pl.ds(1, W2), :] = x_ref[1, h]
    _rows(H, copy_row)

    def conv1_row(r):
        # tap (dy, dx) reads x_pad[2r+dy, 2j+dx] == xp[dx%2, 2r+dy, j+dx//2]
        acc = _acc_taps(
            lambda dy, dx: xp_ref[dx % 2, 2 * r + dy, pl.ds(dx // 2, Wo), :],
            w1_ref, Wo, cout)
        yp_ref[r + 1, pl.ds(1, Wo), :] = jnp.maximum(
            acc * s1_ref[...] + b1_ref[...], 0.0)
    _rows(Ho, conv1_row)

    def conv2_row(r):
        acc = _acc_taps(lambda dy, dx: yp_ref[r + dy, pl.ds(dx, Wo), :],
                        w2_ref, Wo, cout)
        acc = acc * s2_ref[...] + b2_ref[...]
        # fused shortcut: 1x1 stride-2 conv + BN on x[2r, 2j] == xp[1, 2r+1, j]
        idl = xp_ref[1, 2 * r + 1, pl.ds(0, Wo), :].astype(jnp.bfloat16)
        ident = jnp.dot(idl, wd_ref[...], preferred_element_type=jnp.float32)
        acc = acc + ident * sd_ref[...] + bd_ref[...]
        o_ref[r] = jnp.maximum(acc, 0.0)
    _rows(Ho, conv2_row)


def _pool_fc_kernel(x_ref, w_ref, b_ref, o_ref):
    # x: (N, H*W, C) -> global average pool -> fc  (all in one kernel)
    pooled = jnp.mean(x_ref[...], axis=1)                       # (N, C) f32
    o_ref[...] = (jnp.dot(pooled.astype(jnp.bfloat16), w_ref[...],
                          preferred_element_type=jnp.float32) + b_ref[...])


# ----------------------------------------------------------------------------
# pallas_call wrappers
# ----------------------------------------------------------------------------
def _stem(x, w, scale, shift):
    N, H, W, C = x.shape
    cout = w.shape[2]
    kernel = functools.partial(_stem_kernel, H=H, W=W, cout=cout)
    return pl.pallas_call(
        kernel,
        out_shape=jax.ShapeDtypeStruct((N, H, W, cout), jnp.float32),
        grid=(N,),
        in_specs=[
            pl.BlockSpec((None, H, W, C), lambda n: (n, 0, 0, 0)),
            pl.BlockSpec((9, C, cout), lambda n: (0, 0, 0)),
            pl.BlockSpec((1, cout), lambda n: (0, 0)),
            pl.BlockSpec((1, cout), lambda n: (0, 0)),
        ],
        out_specs=pl.BlockSpec((None, H, W, cout), lambda n: (n, 0, 0, 0)),
        scratch_shapes=[pltpu.VMEM((H + 2, W + 2, C), jnp.float32)],
        compiler_params=_cparams(("parallel",)),
    )(x, w, scale, shift)


def _block_s1(x, blk):
    N, H, W, C = x.shape
    cout = blk["w1"].shape[2]
    kernel = functools.partial(_block_s1_kernel, H=H, W=W, cout=cout)
    return pl.pallas_call(
        kernel,
        out_shape=jax.ShapeDtypeStruct((N, H, W, cout), jnp.float32),
        grid=(N,),
        in_specs=[
            pl.BlockSpec((None, H, W, C), lambda n: (n, 0, 0, 0)),
            pl.BlockSpec((9, C, cout), lambda n: (0, 0, 0)),
            pl.BlockSpec((1, cout), lambda n: (0, 0)),
            pl.BlockSpec((1, cout), lambda n: (0, 0)),
            pl.BlockSpec((9, cout, cout), lambda n: (0, 0, 0)),
            pl.BlockSpec((1, cout), lambda n: (0, 0)),
            pl.BlockSpec((1, cout), lambda n: (0, 0)),
        ],
        out_specs=pl.BlockSpec((None, H, W, cout), lambda n: (n, 0, 0, 0)),
        scratch_shapes=[
            pltpu.VMEM((H + 2, W + 2, C), jnp.float32),      # padded input
            pltpu.VMEM((H + 2, W + 2, cout), jnp.float32),   # padded conv1 out
        ],
        compiler_params=_cparams(("parallel",)),
    )(x, blk["w1"], blk["s1"], blk["b1"], blk["w2"], blk["s2"], blk["b2"])


def _block_down(x, blk):
    N, H, W, C = x.shape
    cout = blk["w1"].shape[2]
    W2 = W // 2
    Ho, Wo = H // 2, W // 2
    # Layout glue only (1x data): split width into (even, odd) column planes
    # so the stride-2 taps become contiguous in-kernel slices.
    xs = x.reshape(N, H, W2, 2, C).transpose(0, 3, 1, 2, 4)  # (N, 2, H, W2, C)
    kernel = functools.partial(_block_down_kernel, H=H, W=W, cout=cout)
    return pl.pallas_call(
        kernel,
        out_shape=jax.ShapeDtypeStruct((N, Ho, Wo, cout), jnp.float32),
        grid=(N,),
        in_specs=[
            pl.BlockSpec((None, 2, H, W2, C), lambda n: (n, 0, 0, 0, 0)),
            pl.BlockSpec((9, C, cout), lambda n: (0, 0, 0)),
            pl.BlockSpec((1, cout), lambda n: (0, 0)),
            pl.BlockSpec((1, cout), lambda n: (0, 0)),
            pl.BlockSpec((9, cout, cout), lambda n: (0, 0, 0)),
            pl.BlockSpec((1, cout), lambda n: (0, 0)),
            pl.BlockSpec((1, cout), lambda n: (0, 0)),
            pl.BlockSpec((C, cout), lambda n: (0, 0)),
            pl.BlockSpec((1, cout), lambda n: (0, 0)),
            pl.BlockSpec((1, cout), lambda n: (0, 0)),
        ],
        out_specs=pl.BlockSpec((None, Ho, Wo, cout), lambda n: (n, 0, 0, 0)),
        scratch_shapes=[
            pltpu.VMEM((2, H + 2, W2 + 1, C), jnp.float32),   # padded s2d input
            pltpu.VMEM((Ho + 2, Wo + 2, cout), jnp.float32),  # padded conv1 out
        ],
        compiler_params=_cparams(("parallel",)),
    )(xs, blk["w1"], blk["s1"], blk["b1"], blk["w2"], blk["s2"], blk["b2"],
      blk["wd"], blk["sd"], blk["bd"])


def _pool_fc(x3, w, b):
    N, HW, C = x3.shape
    F = w.shape[1]
    return pl.pallas_call(
        _pool_fc_kernel,
        out_shape=jax.ShapeDtypeStruct((N, F), jnp.float32),
        grid=(1,),
        in_specs=[
            pl.BlockSpec((N, HW, C), lambda i: (0, 0, 0)),
            pl.BlockSpec((C, F), lambda i: (0, 0)),
            pl.BlockSpec((1, F), lambda i: (0, 0)),
        ],
        out_specs=pl.BlockSpec((N, F), lambda i: (0, 0)),
        compiler_params=_cparams(("arbitrary",)),
    )(x3, w, b)


# ----------------------------------------------------------------------------
# Deterministic parameter initialization (ResNet-18 / BasicBlock [2,2,2,2])
# ----------------------------------------------------------------------------
def _conv3x3_w(key, cin, cout):
    # stored as (9, cin, cout), tap order (dy, dx); pre-cast to bf16 (MXU path)
    std = (2.0 / (9 * cin)) ** 0.5
    return (std * jax.random.normal(key, (9, cin, cout), jnp.float32)
            ).astype(jnp.bfloat16)


def _conv1x1_w(key, cin, cout):
    std = (2.0 / cin) ** 0.5
    return (std * jax.random.normal(key, (cin, cout), jnp.float32)
            ).astype(jnp.bfloat16)


def _bn_affine(key, c, eps=1e-5):
    # eval-mode (Split)BatchNorm folded into per-channel scale/shift (f32)
    k1, k2 = jax.random.split(key)
    gamma = 1.0 + 0.1 * jax.random.normal(k1, (1, c), jnp.float32)
    beta = 0.1 * jax.random.normal(k2, (1, c), jnp.float32)
    running_mean = jnp.zeros((1, c), jnp.float32)
    running_var = jnp.ones((1, c), jnp.float32)
    scale = gamma / jnp.sqrt(running_var + eps)
    shift = beta - running_mean * scale
    return scale, shift


def init_params(key, feature_dim=128):
    keys = iter(jax.random.split(key, 64))
    p = {}
    # stem: conv1 replaced by 3x3 / stride 1 / pad 1 (ModelBase CIFAR recipe);
    # input channels are zero-padded 3 -> 16 (bf16-tile-friendly K).
    p["stem_w"] = _conv3x3_w(next(keys), 16, 64)
    p["stem_scale"], p["stem_shift"] = _bn_affine(next(keys), 64)

    layer_cfg = [(64, 64, 1), (64, 128, 2), (128, 256, 2), (256, 512, 2)]
    layers = []
    for cin, cout, stride in layer_cfg:
        blocks = []
        for b in range(2):
            s = stride if b == 0 else 1
            bin_ = cin if b == 0 else cout
            blk = {"down": (s != 1) or (bin_ != cout)}
            blk["w1"] = _conv3x3_w(next(keys), bin_, cout)
            blk["s1"], blk["b1"] = _bn_affine(next(keys), cout)
            blk["w2"] = _conv3x3_w(next(keys), cout, cout)
            blk["s2"], blk["b2"] = _bn_affine(next(keys), cout)
            if blk["down"]:
                blk["wd"] = _conv1x1_w(next(keys), bin_, cout)
                blk["sd"], blk["bd"] = _bn_affine(next(keys), cout)
            blocks.append(blk)
        layers.append(blocks)
    p["layers"] = layers

    p["fc_w"] = (0.05 * jax.random.normal(next(keys), (512, feature_dim),
                                          jnp.float32)).astype(jnp.bfloat16)
    p["fc_b"] = 0.05 * jax.random.normal(next(keys), (1, feature_dim),
                                         jnp.float32)
    return p


# ----------------------------------------------------------------------------
# Forward pass
# ----------------------------------------------------------------------------
def model_forward(params, x_nchw):
    # layout: PyTorch NCHW -> NHWC once (channels on TPU lanes); pad the 3
    # input channels with zeros to 16 so the stem matmul K matches bf16 tiling.
    x = jnp.transpose(x_nchw, (0, 2, 3, 1)).astype(jnp.float32)
    cin = x.shape[-1]
    x = jnp.pad(x, ((0, 0), (0, 0), (0, 0), (0, 16 - cin)))

    y = _stem(x, params["stem_w"], params["stem_scale"], params["stem_shift"])

    for blocks in params["layers"]:
        for blk in blocks:
            y = _block_down(y, blk) if blk["down"] else _block_s1(y, blk)

    N, Ho, Wo, C = y.shape
    return _pool_fc(y.reshape(N, Ho * Wo, C), params["fc_w"], params["fc_b"])


if __name__ == "__main__":
    key = jax.random.PRNGKey(0)
    kp, kx = jax.random.split(key)
    params = init_params(kp, feature_dim=128)
    x = jax.random.normal(kx, (2, 3, 16, 16), jnp.float32)  # NCHW, small image
    out = model_forward(params, x)
    jax.block_until_ready(out)
    assert out.shape == (2, 128) and out.dtype == jnp.float32
    assert bool(jnp.all(jnp.isfinite(out)))
    print("KERNEL_OK")
</pallas_src>

<mosaic_0001>
module attributes {stable_mosaic.version = 11 : i64} {
  func.func @_stem_kernel(%arg0: i32, %arg1: memref<1x16x16x16xf32, #tpu.memory_space<vmem>>, %arg2: memref<9x16x64xbf16, #tpu.memory_space<vmem>>, %arg3: memref<1x64xf32, #tpu.memory_space<vmem>>, %arg4: memref<1x64xf32, #tpu.memory_space<vmem>>, %arg5: memref<1x16x16x64xf32, #tpu.memory_space<vmem>>, %arg6: memref<18x18x16xf32, #tpu.memory_space<vmem>>) attributes {dimension_semantics = [#tpu.dimension_semantics<parallel>], iteration_bounds = array<i64: 2>, scalar_prefetch = 0 : i64, scratch_operands = 1 : i64, tpu.core_type = #tpu.core_type<tc>, window_params = [{transform_indices = @transform_0, window_bounds = array<i64: 1, 16, 16, 16>}, {pipeline_mode = #tpu.pipeline_mode<synchronous>, transform_indices = @transform_1, window_bounds = array<i64: 9, 16, 64>}, {pipeline_mode = #tpu.pipeline_mode<synchronous>, transform_indices = @transform_2, window_bounds = array<i64: 1, 64>}, {pipeline_mode = #tpu.pipeline_mode<synchronous>, transform_indices = @transform_3, window_bounds = array<i64: 1, 64>}, {transform_indices = @transform_4, window_bounds = array<i64: 1, 16, 16, 64>}]} {
    %cst = arith.constant 0.000000e+00 : f32
    %0 = vector.broadcast %cst : f32 to vector<18x18x16xf32>
    %c0 = arith.constant 0 : index
    %c0_0 = arith.constant 0 : index
    %c0_1 = arith.constant 0 : index
    %1 = vector.load %arg6[%c0, %c0_0, %c0_1] : memref<18x18x16xf32, #tpu.memory_space<vmem>>, vector<18x18x16xf32>
    tpu.vector_store %arg6[%c0, %c0_0, %c0_1], %0 {strides = array<i32>} : memref<18x18x16xf32, #tpu.memory_space<vmem>>, vector<18x18x16xf32>,
    %c0_i32 = arith.constant 0 : i32
    %c16_i32 = arith.constant 16 : i32
    %2 = arith.addi %c0_i32, %c16_i32 : i32
    %c1_i32 = arith.constant 1 : i32
    scf.for %arg7 = %c0_i32 to %2 step %c1_i32  : i32 {
      %c0_7 = arith.constant 0 : index
      %4 = arith.index_cast %arg7 : i32 to index
      %c0_8 = arith.constant 0 : index
      %c0_9 = arith.constant 0 : index
      %5 = vector.load %arg1[%c0_7, %4, %c0_8, %c0_9] : memref<1x16x16x16xf32, #tpu.memory_space<vmem>>, vector<1x1x16x16xf32>
      %6 = vector.shape_cast %5 : vector<1x1x16x16xf32> to vector<16x16xf32>
      %c1_i32_10 = arith.constant 1 : i32
      %7 = arith.addi %arg7, %c1_i32_10 : i32
      %8 = arith.index_cast %7 : i32 to index
      %c1 = arith.constant 1 : index
      %c0_11 = arith.constant 0 : index
      %9 = vector.load %arg6[%8, %c1, %c0_11] : memref<18x18x16xf32, #tpu.memory_space<vmem>>, vector<1x16x16xf32>
      %10 = vector.shape_cast %9 : vector<1x16x16xf32> to vector<16x16xf32>
      %11 = vector.shape_cast %6 : vector<16x16xf32> to vector<1x16x16xf32>
      tpu.vector_store %arg6[%8, %c1, %c0_11], %11 {strides = array<i32>} : memref<18x18x16xf32, #tpu.memory_space<vmem>>, vector<1x16x16xf32>,
    }
    %c16_i32_2 = arith.constant 16 : i32
    %c0_i32_3 = arith.constant 0 : i32
    %c16_i32_4 = arith.constant 16 : i32
    %3 = arith.addi %c0_i32_3, %c16_i32_4 : i32
    %c1_i32_5 = arith.constant 1 : i32
    scf.for %arg7 = %c0_i32_3 to %3 step %c1_i32_5  : i32 {
      %cst_7 = arith.constant 0.000000e+00 : f32
      %4 = vector.broadcast %cst_7 : f32 to vector<16x64xf32>
      %c0_i32_8 = arith.constant 0 : i32
      %5 = arith.addi %arg7, %c0_i32_8 : i32
      %6 = arith.index_cast %5 : i32 to index
      %c0_9 = arith.constant 0 : index
      %c0_10 = arith.constant 0 : index
      %7 = vector.load %arg6[%6, %c0_9, %c0_10] : memref<18x18x16xf32, #tpu.memory_space<vmem>>, vector<1x16x16xf32>
      %8 = vector.shape_cast %7 : vector<1x16x16xf32> to vector<16x16xf32>
      %9 = arith.truncf %8 : vector<16x16xf32> to vector<16x16xbf16>
      %c0_11 = arith.constant 0 : index
      %c0_12 = arith.constant 0 : index
      %c0_13 = arith.constant 0 : index
      %10 = vector.load %arg2[%c0_11, %c0_12, %c0_13] : memref<9x16x64xbf16, #tpu.memory_space<vmem>>, vector<1x16x64xbf16>
      %11 = vector.shape_cast %10 : vector<1x16x64xbf16> to vector<16x64xbf16>
      %cst_14 = arith.constant dense<0.000000e+00> : vector<16x64xf32>
      %12 = tpu.matmul %9, %11, %cst_14 {dimension_numbers = #tpu.dot_dimension_numbers<[1], [0], [0], [1], [0, 0, 1, 1], [], []>} : vector<16x16xbf16>, vector<16x64xbf16>, vector<16x64xf32> -> vector<16x64xf32>
      %13 = arith.addf %4, %12 : vector<16x64xf32>
      %c0_i32_15 = arith.constant 0 : i32
      %14 = arith.addi %arg7, %c0_i32_15 : i32
      %15 = arith.index_cast %14 : i32 to index
      %c1 = arith.constant 1 : index
      %c0_16 = arith.constant 0 : index
      %16 = vector.load %arg6[%15, %c1, %c0_16] : memref<18x18x16xf32, #tpu.memory_space<vmem>>, vector<1x16x16xf32>
      %17 = vector.shape_cast %16 : vector<1x16x16xf32> to vector<16x16xf32>
      %18 = arith.truncf %17 : vector<16x16xf32> to vector<16x16xbf16>
      %c1_17 = arith.constant 1 : index
      %c0_18 = arith.constant 0 : index
      %c0_19 = arith.constant 0 : index
      %19 = vector.load %arg2[%c1_17, %c0_18, %c0_19] : memref<9x16x64xbf16, #tpu.memory_space<vmem>>, vector<1x16x64xbf16>
      %20 = vector.shape_cast %19 : vector<1x16x64xbf16> to vector<16x64xbf16>
      %cst_20 = arith.constant dense<0.000000e+00> : vector<16x64xf32>
      %21 = tpu.matmul %18, %20, %cst_20 {dimension_numbers = #tpu.dot_dimension_numbers<[1], [0], [0], [1], [0, 0, 1, 1], [], []>} : vector<16x16xbf16>, vector<16x64xbf16>, vector<16x64xf32> -> vector<16x64xf32>
      %22 = arith.addf %13, %21 : vector<16x64xf32>
      %c0_i32_21 = arith.constant 0 : i32
      %23 = arith.addi %arg7, %c0_i32_21 : i32
      %24 = arith.index_cast %23 : i32 to index
      %c2 = arith.constant 2 : index
      %c0_22 = arith.constant 0 : index
      %25 = vector.load %arg6[%24, %c2, %c0_22] : memref<18x18x16xf32, #tpu.memory_space<vmem>>, vector<1x16x16xf32>
      %26 = vector.shape_cast %25 : vector<1x16x16xf32> to vector<16x16xf32>
      %27 = arith.truncf %26 : vector<16x16xf32> to vector<16x16xbf16>
      %c2_23 = arith.constant 2 : index
      %c0_24 = arith.constant 0 : index
      %c0_25 = arith.constant 0 : index
      %28 = vector.load %arg2[%c2_23, %c0_24, %c0_25] : memref<9x16x64xbf16, #tpu.memory_space<vmem>>, vector<1x16x64xbf16>
      %29 = vector.shape_cast %28 : vector<1x16x64xbf16> to vector<16x64xbf16>
      %cst_26 = arith.constant dense<0.000000e+00> : vector<16x64xf32>
      %30 = tpu.matmul %27, %29, %cst_26 {dimension_numbers = #tpu.dot_dimension_numbers<[1], [0], [0], [1], [0, 0, 1, 1], [], []>} : vector<16x16xbf16>, vector<16x64xbf16>, vector<16x64xf32> -> vector<16x64xf32>
      %31 = arith.addf %22, %30 : vector<16x64xf32>
      %c1_i32_27 = arith.constant 1 : i32
      %32 = arith.addi %arg7, %c1_i32_27 : i32
      %33 = arith.index_cast %32 : i32 to index
      %c0_28 = arith.constant 0 : index
      %c0_29 = arith.constant 0 : index
      %34 = vector.load %arg6[%33, %c0_28, %c0_29] : memref<18x18x16xf32, #tpu.memory_space<vmem>>, vector<1x16x16xf32>
      %35 = vector.shape_cast %34 : vector<1x16x16xf32> to vector<16x16xf32>
      %36 = arith.truncf %35 : vector<16x16xf32> to vector<16x16xbf16>
      %c3 = arith.constant 3 : index
      %c0_30 = arith.constant 0 : index
      %c0_31 = arith.constant 0 : index
      %37 = vector.load %arg2[%c3, %c0_30, %c0_31] : memref<9x16x64xbf16, #tpu.memory_space<vmem>>, vector<1x16x64xbf16>
      %38 = vector.shape_cast %37 : vector<1x16x64xbf16> to vector<16x64xbf16>
      %cst_32 = arith.constant dense<0.000000e+00> : vector<16x64xf32>
      %39 = tpu.matmul %36, %38, %cst_32 {dimension_numbers = #tpu.dot_dimension_numbers<[1], [0], [0], [1], [0, 0, 1, 1], [], []>} : vector<16x16xbf16>, vector<16x64xbf16>, vector<16x64xf32> -> vector<16x64xf32>
      %40 = arith.addf %31, %39 : vector<16x64xf32>
      %c1_i32_33 = arith.constant 1 : i32
      %41 = arith.addi %arg7, %c1_i32_33 : i32
      %42 = arith.index_cast %41 : i32 to index
      %c1_34 = arith.constant 1 : index
      %c0_35 = arith.constant 0 : index
      %43 = vector.load %arg6[%42, %c1_34, %c0_35] : memref<18x18x16xf32, #tpu.memory_space<vmem>>, vector<1x16x16xf32>
      %44 = vector.shape_cast %43 : vector<1x16x16xf32> to vector<16x16xf32>
      %45 = arith.truncf %44 : vector<16x16xf32> to vector<16x16xbf16>
      %c4 = arith.constant 4 : index
      %c0_36 = arith.constant 0 : index
      %c0_37 = arith.constant 0 : index
      %46 = vector.load %arg2[%c4, %c0_36, %c0_37] : memref<9x16x64xbf16, #tpu.memory_space<vmem>>, vector<1x16x64xbf16>
      %47 = vector.shape_cast %46 : vector<1x16x64xbf16> to vector<16x64xbf16>
      %cst_38 = arith.constant dense<0.000000e+00> : vector<16x64xf32>
      %48 = tpu.matmul %45, %47, %cst_38 {dimension_numbers = #tpu.dot_dimension_numbers<[1], [0], [0], [1], [0, 0, 1, 1], [], []>} : vector<16x16xbf16>, vector<16x64xbf16>, vector<16x64xf32> -> vector<16x64xf32>
      %49 = arith.addf %40, %48 : vector<16x64xf32>
      %c1_i32_39 = arith.constant 1 : i32
      %50 = arith.addi %arg7, %c1_i32_39 : i32
      %51 = arith.index_cast %50 : i32 to index
      %c2_40 = arith.constant 2 : index
      %c0_41 = arith.constant 0 : index
      %52 = vector.load %arg6[%51, %c2_40, %c0_41] : memref<18x18x16xf32, #tpu.memory_space<vmem>>, vector<1x16x16xf32>
      %53 = vector.shape_cast %52 : vector<1x16x16xf32> to vector<16x16xf32>
      %54 = arith.truncf %53 : vector<16x16xf32> to vector<16x16xbf16>
      %c5 = arith.constant 5 : index
      %c0_42 = arith.constant 0 : index
      %c0_43 = arith.constant 0 : index
      %55 = vector.load %arg2[%c5, %c0_42, %c0_43] : memref<9x16x64xbf16, #tpu.memory_space<vmem>>, vector<1x16x64xbf16>
      %56 = vector.shape_cast %55 : vector<1x16x64xbf16> to vector<16x64xbf16>
      %cst_44 = arith.constant dense<0.000000e+00> : vector<16x64xf32>
      %57 = tpu.matmul %54, %56, %cst_44 {dimension_numbers = #tpu.dot_dimension_numbers<[1], [0], [0], [1], [0, 0, 1, 1], [], []>} : vector<16x16xbf16>, vector<16x64xbf16>, vector<16x64xf32> -> vector<16x64xf32>
      %58 = arith.addf %49, %57 : vector<16x64xf32>
      %c2_i32 = arith.constant 2 : i32
      %59 = arith.addi %arg7, %c2_i32 : i32
      %60 = arith.index_cast %59 : i32 to index
      %c0_45 = arith.constant 0 : index
      %c0_46 = arith.constant 0 : index
      %61 = vector.load %arg6[%60, %c0_45, %c0_46] : memref<18x18x16xf32, #tpu.memory_space<vmem>>, vector<1x16x16xf32>
      %62 = vector.shape_cast %61 : vector<1x16x16xf32> to vector<16x16xf32>
      %63 = arith.truncf %62 : vector<16x16xf32> to vector<16x16xbf16>
      %c6 = arith.constant 6 : index
      %c0_47 = arith.constant 0 : index
      %c0_48 = arith.constant 0 : index
      %64 = vector.load %arg2[%c6, %c0_47, %c0_48] : memref<9x16x64xbf16, #tpu.memory_space<vmem>>, vector<1x16x64xbf16>
      %65 = vector.shape_cast %64 : vector<1x16x64xbf16> to vector<16x64xbf16>
      %cst_49 = arith.constant dense<0.000000e+00> : vector<16x64xf32>
      %66 = tpu.matmul %63, %65, %cst_49 {dimension_numbers = #tpu.dot_dimension_numbers<[1], [0], [0], [1], [0, 0, 1, 1], [], []>} : vector<16x16xbf16>, vector<16x64xbf16>, vector<16x64xf32> -> vector<16x64xf32>
      %67 = arith.addf %58, %66 : vector<16x64xf32>
      %c2_i32_50 = arith.constant 2 : i32
      %68 = arith.addi %arg7, %c2_i32_50 : i32
      %69 = arith.index_cast %68 : i32 to index
      %c1_51 = arith.constant 1 : index
      %c0_52 = arith.constant 0 : index
      %70 = vector.load %arg6[%69, %c1_51, %c0_52] : memref<18x18x16xf32, #tpu.memory_space<vmem>>, vector<1x16x16xf32>
      %71 = vector.shape_cast %70 : vector<1x16x16xf32> to vector<16x16xf32>
      %72 = arith.truncf %71 : vector<16x16xf32> to vector<16x16xbf16>
      %c7 = arith.constant 7 : index
      %c0_53 = arith.constant 0 : index
      %c0_54 = arith.constant 0 : index
      %73 = vector.load %arg2[%c7, %c0_53, %c0_54] : memref<9x16x64xbf16, #tpu.memory_space<vmem>>, vector<1x16x64xbf16>
      %74 = vector.shape_cast %73 : vector<1x16x64xbf16> to vector<16x64xbf16>
      %cst_55 = arith.constant dense<0.000000e+00> : vector<16x64xf32>
      %75 = tpu.matmul %72, %74, %cst_55 {dimension_numbers = #tpu.dot_dimension_numbers<[1], [0], [0], [1], [0, 0, 1, 1], [], []>} : vector<16x16xbf16>, vector<16x64xbf16>, vector<16x64xf32> -> vector<16x64xf32>
      %76 = arith.addf %67, %75 : vector<16x64xf32>
      %c2_i32_56 = arith.constant 2 : i32
      %77 = arith.addi %arg7, %c2_i32_56 : i32
      %78 = arith.index_cast %77 : i32 to index
      %c2_57 = arith.constant 2 : index
      %c0_58 = arith.constant 0 : index
      %79 = vector.load %arg6[%78, %c2_57, %c0_58] : memref<18x18x16xf32, #tpu.memory_space<vmem>>, vector<1x16x16xf32>
      %80 = vector.shape_cast %79 : vector<1x16x16xf32> to vector<16x16xf32>
      %81 = arith.truncf %80 : vector<16x16xf32> to vector<16x16xbf16>
      %c8 = arith.constant 8 : index
      %c0_59 = arith.constant 0 : index
      %c0_60 = arith.constant 0 : index
      %82 = vector.load %arg2[%c8, %c0_59, %c0_60] : memref<9x16x64xbf16, #tpu.memory_space<vmem>>, vector<1x16x64xbf16>
      %83 = vector.shape_cast %82 : vector<1x16x64xbf16> to vector<16x64xbf16>
      %cst_61 = arith.constant dense<0.000000e+00> : vector<16x64xf32>
      %84 = tpu.matmul %81, %83, %cst_61 {dimension_numbers = #tpu.dot_dimension_numbers<[1], [0], [0], [1], [0, 0, 1, 1], [], []>} : vector<16x16xbf16>, vector<16x64xbf16>, vector<16x64xf32> -> vector<16x64xf32>
      %85 = arith.addf %76, %84 : vector<16x64xf32>
      %c0_62 = arith.constant 0 : index
      %c0_63 = arith.constant 0 : index
      %86 = vector.load %arg3[%c0_62, %c0_63] : memref<1x64xf32, #tpu.memory_space<vmem>>, vector<1x64xf32>
      %87 = vector.broadcast %86 : vector<1x64xf32> to vector<16x64xf32>
      %88 = arith.mulf %85, %87 : vector<16x64xf32>
      %c0_64 = arith.constant 0 : index
      %c0_65 = arith.constant 0 : index
      %89 = vector.load %arg4[%c0_64, %c0_65] : memref<1x64xf32, #tpu.memory_space<vmem>>, vector<1x64xf32>
      %90 = vector.broadcast %89 : vector<1x64xf32> to vector<16x64xf32>
      %91 = arith.addf %88, %90 : vector<16x64xf32>
      %cst_66 = arith.constant 0.000000e+00 : f32
      %92 = vector.broadcast %cst_66 : f32 to vector<16x64xf32>
      %93 = arith.maximumf %91, %92 : vector<16x64xf32>
      %c0_67 = arith.constant 0 : index
      %94 = arith.index_cast %arg7 : i32 to index
      %c0_68 = arith.constant 0 : index
      %c0_69 = arith.constant 0 : index
      %95 = vector.load %arg5[%c0_67, %94, %c0_68, %c0_69] : memref<1x16x16x64xf32, #tpu.memory_space<vmem>>, vector<1x1x16x64xf32>
      %96 = vector.shape_cast %95 : vector<1x1x16x64xf32> to vector<16x64xf32>
      %97 = vector.shape_cast %93 : vector<16x64xf32> to vector<1x1x16x64xf32>
      tpu.vector_store %arg5[%c0_67, %94, %c0_68, %c0_69], %97 {strides = array<i32>} : memref<1x16x16x64xf32, #tpu.memory_space<vmem>>, vector<1x1x16x64xf32>,
    }
    %c16_i32_6 = arith.constant 16 : i32
    return
  }
  func.func @transform_0(%arg0: i32) -> (i32, i32, i32, i32) {
    %c0_i32 = arith.constant 0 : i32
    %c0_i32_0 = arith.constant 0 : i32
    %c0_i32_1 = arith.constant 0 : i32
    %c0_i32_2 = arith.constant 0 : i32
    return %arg0, %c0_i32, %c0_i32_0, %c0_i32_1 : i32, i32, i32, i32
  }
  func.func @transform_1(%arg0: i32) -> (i32, i32, i32) {
    %c0_i32 = arith.constant 0 : i32
    %c0_i32_0 = arith.constant 0 : i32
    %c0_i32_1 = arith.constant 0 : i32
    %c0_i32_2 = arith.constant 0 : i32
    return %c0_i32, %c0_i32_0, %c0_i32_1 : i32, i32, i32
  }
  func.func @transform_2(%arg0: i32) -> (i32, i32) {
    %c0_i32 = arith.constant 0 : i32
    %c0_i32_0 = arith.constant 0 : i32
    %c0_i32_1 = arith.constant 0 : i32
    return %c0_i32, %c0_i32_0 : i32, i32
  }
  func.func @transform_3(%arg0: i32) -> (i32, i32) {
    %c0_i32 = arith.constant 0 : i32
    %c0_i32_0 = arith.constant 0 : i32
    %c0_i32_1 = arith.constant 0 : i32
    return %c0_i32, %c0_i32_0 : i32, i32
  }
  func.func @transform_4(%arg0: i32) -> (i32, i32, i32, i32) {
    %c0_i32 = arith.constant 0 : i32
    %c0_i32_0 = arith.constant 0 : i32
    %c0_i32_1 = arith.constant 0 : i32
    %c0_i32_2 = arith.constant 0 : i32
    return %arg0, %c0_i32, %c0_i32_0, %c0_i32_1 : i32, i32, i32, i32
  }
}

</mosaic_0001>

<bundles_post_ra>
// kernel: tpu_custom_call.1
= control target key start
LH: loop header
LB: loop body
LE: loop exit
PB: predicated region body
PF: predicated region fallthrough
CT: control target
= control target key end

     0   :  { %9 = vsyncpa [#allocation4], 0  ;;  %s1691_s0 = inlined_call_operand.hbm [shape: f32[2,16,16,16], index: 0, kind: input, shape index: {}]   ;;  %s1692_s1 = inlined_call_operand.hbm [shape: bf16[9,16,64], index: 1, kind: input, shape index: {}]   ;;  %s1693_s2 = inlined_call_operand.vmem [shape: f32[1,64], index: 2, kind: input, shape index: {}]   ;;  %s1694_s3 = inlined_call_operand.vmem [shape: f32[1,64], index: 3, kind: input, shape index: {}]   ;;  %s1695_s4 = inlined_call_operand.hbm [shape: f32[2,16,16,64], index: 4, kind: output, shape index: {}]  }
   0x1   :  { %11 = vsyncpa [#allocation4 + $0x1], 0 }
   0x2   :  { %12 = vsyncpa [#allocation7], 0 }
   0x3   :  { %13 = vsyncpa [#allocation5], 0 }
   0x4   :  { %15 = vsyncpa [#allocation5 + $0x1], 0  ;;  %s1375_s15 = smov 0   ;;  %s1377_s16 = smov 0  }
   0x5   :  { %s1379_s17 = smov 0   ;;  %s1381_s18 = smov 0  }
   0x6 LB: > { %s1396_s19 = sadd.s32 4294967295, %s1328_s18   ;;  %s981_s20 = sadd.s32 4294967294, %s1328_s18   ;;  %s1328_s18 = sphi %s1381_s18, %s1717_s18   ;;  %s1324_s17 = sphi %s1379_s17, %s1716_s17   ;;  %s1320_s16 = sphi %s1377_s16, %s1715_s16   ;;  %s1316_s15 = sphi %s1375_s15, %s1714_s15  }
   0x7   : > { %p41_p0 = scmp.ne.s32.totalorder %s1320_s16, %s1316_s15  ;;  %p1696_p1 = scmp.eq.s32.totalorder %s1396_s19, 0 }
   0x8   : > { %p134_p3 = scmp.eq.s32.totalorder %s981_s20, 1  ;;  %p982_p5 = scmp.ge.s32.totalorder %s1328_s18, 1 }
   0x9   : > { %p1405_p4 = por %p1696_p1, %p41_p0  ;;  %p141_p7 = scmp.lt.s32.totalorder %s1328_s18, 3 }
   0xa   : > { %p1410_p6 = por %p134_p3, %p41_p0  ;;  %s1338_s24 = smov [#allocation6]  }
   0xb   : > { %s1700_s21 = scalar_select %p1405_p4, 1, 0 }
   0xc   : > { %s1701_s22 = scalar_select %p1410_p6, 1, 0 }
   0xd   : > { %p1415_p8 = pnand %p982_p5, %p141_p7  ;;  %s153_s25 = sshll.u32 %s1338_s24, 4  ;;  %s154_s25 = int_to_ptr.vmem [resolvable:$true] %s153_s25 }
   0xe   : > { %s1429_s27 = sadd.s32 1, %s1328_s18   ;;  %s28_s28 = sadd.s32 1, %s1324_s17 }
   0xf   : > { %s1702_s23 = scalar_select %p1415_p8, 1, 0 }
  0x10   : > { %p1115_p9 = pneg %p1415_p8  ;;  %s25_s29 = ssub.s32 %s1328_s18, %s1429_s27 }
  0x11   : > { %s1209_s30 = scalar_lea.vmem %s154_s25, 1152  ;;  %p1217_p5 = scmp.lt.s32.totalorder %s154_s25, %s154_s25 }
  0x12   : > { %p1424_p11 = pnand %p1115_p9, %p1696_p1  ;;  %p1210_p13 = scmp.ne.s32.totalorder %s154_s25, %s1209_s30 }
  0x13   : > { %p1218_p7 = scmp.lt.s32.totalorder %s1209_s30, %s1209_s30 }
  0x14   : > { %p1200_p12 = pneg %p1424_p11 }
  0x15   : > { %p1219_p10 = por %p1218_p7, %p1217_p5 }
  0x16   : > { %p1212_p0 = pnand %p1210_p13, %p1200_p12 }
  0x18   : > { %p1213_p3 = pneg %p1212_p0 }
  0x1a   : > { %p1220_p2 = pnand %p1219_p10, %p1213_p3 }
  0x1c   : > { %1223 = shalt.err (!%p1220_p2)
}
  0x1d   : > { %s1339_s5 = smov 64   ;;  %s1340_s6 = smov 4  }
  0x1e   : > { %1118 = dma.hbm_to_vmem [thread:$0]  (!%p1424_p11), %s1692_s1, 1152, %s154_s25, [#allocation7], %s1339_s5, %s1339_s5, %s1340_s6  }
  0x1f   : > { %p26_p9 = scmp.eq.s32.totalorder %s25_s29, 0  ;;  %p35_p12 = scmp.ne.s32.totalorder %s1324_s17, %s1320_s16 }
  0x20   : > { %p36_p10 = scmp.eq.s32.totalorder %s1328_s18, 0  ;;  %p1128_p2 = scmp.lt.s32.totalorder %s1328_s18, 2 }
  0x21   : > { %s1446_s9 = scalar_select %p26_p9, %s1324_s17, %s28_s28  }
  0x22   : > { %p37_p13 = por %p36_p10, %p35_p12  ;;  %p1704_p0 = scmp.eq.s32.totalorder %s1396_s19, 1 }
  0x23   : > { %s173_s11 = sand.u32 1, %s1324_s17   ;;  %s1033_s12 = sshll.u32 %s1328_s18, 12 }
  0x24   : > { %p1450_p3 = por %p1704_p0, %p35_p12  ;;  %s985_s13 = sshll.u32 %s173_s11, 8 }
  0x25   : > { %s1459_s24 = scalar_lea.hbm %s1691_s0, %s1033_s12  ;;  %s177_s25 = scalar_lea.vmem [#allocation3], %s985_s13 }
  0x26   : > { %s1705_s10 = scalar_select %p1450_p3, 1, 0 }
  0x27   : > { %s184_s26 = sshll.u32 %s177_s25, 4  ;;  %p1461_p11 = pnand %p1128_p2, %p37_p13  ;;  %s1465_s26 = int_to_ptr.vmem [resolvable:$true] %s184_s26 }
  0x28   : > { %s1467_s29 = scalar_lea.sflag [#allocation4], %s173_s11  ;;  %s1224_s30 = scalar_lea.hbm %s1459_s24, 4096 }
  0x29   : > { %p1225_p5 = scmp.ne.s32.totalorder %s1459_s24, %s1224_s30  ;;  %p1226_p7 = pneg %p1461_p11 }
  0x2a   : > { %s1229_s7 = scalar_lea.hbm %s1691_s0, 8192  ;;  %p1230_p10 = scmp.lt.s32.totalorder %s1459_s24, %s1691_s0 }
  0x2b   : > { %p1227_p9 = pnand %p1226_p7, %p1225_p5  ;;  %p1231_p2 = scmp.lt.s32.totalorder %s1229_s7, %s1224_s30 }
  0x2d   : > { %p1228_p12 = pneg %p1227_p9  ;;  %p1232_p13 = por %p1231_p2, %p1230_p10 }
  0x2f   : > { %p1233_p0 = pnand %p1232_p13, %p1228_p12 }
  0x31   : > { %1236 = shalt.err (!%p1233_p0)
}
  0x32   : > { %s1237_s11 = scalar_lea.vmem %s1465_s26, 4096  ;;  %s1341_s13 = smov [#allocation3]  }
  0x33   : > { %p1238_p1 = scmp.ne.s32.totalorder %s1465_s26, %s1237_s11  ;;  %s1242_s14 = sshll.u32 %s1341_s13, 4  ;;  %s1243_s14 = int_to_ptr.vmem [resolvable:$false] %s1242_s14 }
  0x34   : > { %s1244_s20 = scalar_lea.vmem %s1243_s14, 8192  ;;  %p1245_p9 = scmp.lt.s32.totalorder %s1465_s26, %s1243_s14 }
  0x35   : > { %p1240_p6 = pnand %p1238_p1, %p1226_p7  ;;  %p1246_p3 = scmp.lt.s32.totalorder %s1244_s20, %s1237_s11 }
  0x37   : > { %p1241_p5 = pneg %p1240_p6  ;;  %p1247_p4 = por %p1246_p3, %p1245_p9 }
  0x39   : > { %p1248_p8 = pnand %p1247_p4, %p1241_p5 }
  0x3b   : > { %1251 = shalt.err (!%p1248_p8)
}
  0x3c   : > { %s1342_s25 = smov 128   ;;  %s1343_s30 = smov 8  }
  0x3d   : > { %1122 = dma.hbm_to_vmem [thread:$0]  (!%p1461_p11), %s1459_s24, 4096, %s1465_s26, %s1467_s29, %s1342_s25, %s1342_s25, %s1343_s30  }
  0x3e   : > { %p1707_p1 = scmp.ne.s32.totalorder %s1702_s23, 0 }
  0x3f   : > { %s1491_s5 = sand.u32 (!%p1707_p1), 1, %s1320_s16   ;;  %p1708_p4 = scmp.ne.s32.totalorder (!%p1707_p1), %s1700_s21, 0 }
  0x40   : > { %196 = sbr.rel (%p1707_p1) target bundleno = 368 (0x170), region = 36  ;;  %s989_s6 = sshll.u32 (!%p1707_p1), %s1491_s5, 8 }
  0x41   : > { %s199_s7 = scalar_lea.sflag (!%p1707_p1), [#allocation4], %s1491_s5  ;;  %s1497_s8 = scalar_lea.vmem (!%p1707_p1), [#allocation3], %s989_s6 }
  0x45   : > { %1303 = dma.done.wait (%p1708_p4), %s199_s7, 4096  }
  0x46   : > { %1305 = vsyncadd (%p1708_p4), %s199_s7, 4294963200  ;;  %p1709_p6 = scmp.eq.s32.totalorder %s1396_s19, 0 }
  0x48   : > { %1307 = dma.done.wait (%p1709_p6), [#allocation7], 1152   ;;  %p1710_p8 = pmov %p1709_p6 }
  0x49   : > { %vm232_vm0 = vcmask 130048   ;;  %vm235_vm1 = vcmask 123904   ;;  %v1344_v0 = vmov 0.0   ;;  %s1563_s21 = scalar_lea.vmem [#allocation8], %s989_s6  ;;  %s1330_s23 = smov 0  }
  0x4a   : > { %1309 = vsyncadd (%p1710_p8), [#allocation7], 4294966144  ;;  %233 = vst.msk [vmem:[#allocation2] sm:$0xff] %vm232_vm0, %v1344_v0 }
  0x4b   : > { %234 = vst.msk [vmem:[#allocation2 + $0x8] sm:$0xff] %vm232_vm0, %v1344_v0  ;;  %237 = vst.msk [vmem:[#allocation2 + $0x18] sm:$0xff] %vm232_vm0, %v1344_v0 }
  0x4c   : > { %238 = vst.msk [vmem:[#allocation2 + $0x20] sm:$0xff] %vm232_vm0, %v1344_v0  ;;  %240 = vst.msk [vmem:[#allocation2 + $0x30] sm:$0xff] %vm232_vm0, %v1344_v0 }
  0x4d   : > { %241 = vst.msk [vmem:[#allocation2 + $0x38] sm:$0xff] %vm232_vm0, %v1344_v0  ;;  %243 = vst.msk [vmem:[#allocation2 + $0x48] sm:$0xff] %vm232_vm0, %v1344_v0 }
  0x4e   : > { %244 = vst.msk [vmem:[#allocation2 + $0x50] sm:$0xff] %vm232_vm0, %v1344_v0  ;;  %246 = vst.msk [vmem:[#allocation2 + $0x60] sm:$0xff] %vm232_vm0, %v1344_v0 }
  0x4f   : > { %247 = vst.msk [vmem:[#allocation2 + $0x68] sm:$0xff] %vm232_vm0, %v1344_v0  ;;  %249 = vst.msk [vmem:[#allocation2 + $0x78] sm:$0xff] %vm232_vm0, %v1344_v0 }
  0x50   : > { %250 = vst.msk [vmem:[#allocation2 + $0x80] sm:$0xff] %vm232_vm0, %v1344_v0  ;;  %252 = vst.msk [vmem:[#allocation2 + $0x90] sm:$0xff] %vm232_vm0, %v1344_v0 }
  0x51   : > { %253 = vst.msk [vmem:[#allocation2 + $0x98] sm:$0xff] %vm232_vm0, %v1344_v0  ;;  %255 = vst.msk [vmem:[#allocation2 + $0xa8] sm:$0xff] %vm232_vm0, %v1344_v0 }
  0x52   : > { %256 = vst.msk [vmem:[#allocation2 + $0xb0] sm:$0xff] %vm232_vm0, %v1344_v0  ;;  %258 = vst.msk [vmem:[#allocation2 + $0xc0] sm:$0xff] %vm232_vm0, %v1344_v0 }
  0x53   : > { %259 = vst.msk [vmem:[#allocation2 + $0xc8] sm:$0xff] %vm232_vm0, %v1344_v0  ;;  %261 = vst.msk [vmem:[#allocation2 + $0xd8] sm:$0xff] %vm232_vm0, %v1344_v0 }
  0x54   : > { %262 = vst.msk [vmem:[#allocation2 + $0xe0] sm:$0xff] %vm232_vm0, %v1344_v0  ;;  %264 = vst.msk [vmem:[#allocation2 + $0xf0] sm:$0xff] %vm232_vm0, %v1344_v0 }
  0x55   : > { %265 = vst.msk [vmem:[#allocation2 + $0xf8] sm:$0xff] %vm232_vm0, %v1344_v0  ;;  %267 = vst.msk [vmem:[#allocation2 + $0x108] sm:$0xff] %vm232_vm0, %v1344_v0 }
  0x56   : > { %268 = vst.msk [vmem:[#allocation2 + $0x110] sm:$0xff] %vm232_vm0, %v1344_v0  ;;  %270 = vst.msk [vmem:[#allocation2 + $0x120] sm:$0xff] %vm232_vm0, %v1344_v0 }
  0x57   : > { %271 = vst.msk [vmem:[#allocation2 + $0x128] sm:$0xff] %vm232_vm0, %v1344_v0  ;;  %273 = vst.msk [vmem:[#allocation2 + $0x138] sm:$0xff] %vm232_vm0, %v1344_v0 }
  0x58   : > { %274 = vst.msk [vmem:[#allocation2 + $0x140] sm:$0xff] %vm232_vm0, %v1344_v0  ;;  %276 = vst.msk [vmem:[#allocation2 + $0x150] sm:$0xff] %vm232_vm0, %v1344_v0 }
  0x59   : > { %277 = vst.msk [vmem:[#allocation2 + $0x158] sm:$0xff] %vm232_vm0, %v1344_v0  ;;  %279 = vst.msk [vmem:[#allocation2 + $0x168] sm:$0xff] %vm232_vm0, %v1344_v0 }
  0x5a   : > { %280 = vst.msk [vmem:[#allocation2 + $0x170] sm:$0xff] %vm232_vm0, %v1344_v0  ;;  %282 = vst.msk [vmem:[#allocation2 + $0x180] sm:$0xff] %vm232_vm0, %v1344_v0 }
  0x5b   : > { %283 = vst.msk [vmem:[#allocation2 + $0x188] sm:$0xff] %vm232_vm0, %v1344_v0  ;;  %285 = vst.msk [vmem:[#allocation2 + $0x198] sm:$0xff] %vm232_vm0, %v1344_v0 }
  0x5c   : > { %286 = vst.msk [vmem:[#allocation2 + $0x1a0] sm:$0xff] %vm232_vm0, %v1344_v0 }
  0x5d   : > { %236 = vst.msk [vmem:[#allocation2 + $0x10] sm:$0x3] %vm235_vm1, %v1344_v0  ;;  %239 = vst.msk [vmem:[#allocation2 + $0x28] sm:$0x3] %vm235_vm1, %v1344_v0 }
  0x5e   : > { %242 = vst.msk [vmem:[#allocation2 + $0x40] sm:$0x3] %vm235_vm1, %v1344_v0  ;;  %245 = vst.msk [vmem:[#allocation2 + $0x58] sm:$0x3] %vm235_vm1, %v1344_v0 }
  0x5f   : > { %248 = vst.msk [vmem:[#allocation2 + $0x70] sm:$0x3] %vm235_vm1, %v1344_v0  ;;  %251 = vst.msk [vmem:[#allocation2 + $0x88] sm:$0x3] %vm235_vm1, %v1344_v0 }
  0x60   : > { %254 = vst.msk [vmem:[#allocation2 + $0xa0] sm:$0x3] %vm235_vm1, %v1344_v0  ;;  %257 = vst.msk [vmem:[#allocation2 + $0xb8] sm:$0x3] %vm235_vm1, %v1344_v0 }
  0x61   : > { %260 = vst.msk [vmem:[#allocation2 + $0xd0] sm:$0x3] %vm235_vm1, %v1344_v0  ;;  %263 = vst.msk [vmem:[#allocation2 + $0xe8] sm:$0x3] %vm235_vm1, %v1344_v0 }
  0x62   : > { %266 = vst.msk [vmem:[#allocation2 + $0x100] sm:$0x3] %vm235_vm1, %v1344_v0  ;;  %269 = vst.msk [vmem:[#allocation2 + $0x118] sm:$0x3] %vm235_vm1, %v1344_v0 }
  0x63   : > { %272 = vst.msk [vmem:[#allocation2 + $0x130] sm:$0x3] %vm235_vm1, %v1344_v0  ;;  %275 = vst.msk [vmem:[#allocation2 + $0x148] sm:$0x3] %vm235_vm1, %v1344_v0 }
  0x64   : > { %278 = vst.msk [vmem:[#allocation2 + $0x160] sm:$0x3] %vm235_vm1, %v1344_v0  ;;  %281 = vst.msk [vmem:[#allocation2 + $0x178] sm:$0x3] %vm235_vm1, %v1344_v0 }
  0x65   : > { %284 = vst.msk [vmem:[#allocation2 + $0x190] sm:$0x3] %vm235_vm1, %v1344_v0  ;;  %287 = vst.msk [vmem:[#allocation2 + $0x1a8] sm:$0x3] %vm235_vm1, %v1344_v0 }
  0x66 LB: >> { %s992_s24 = sshll.u32 %s1332_s23, 4  ;;  %s917_s26 = smul.u32 24, %s1332_s23  ;;  %s1332_s23 = sphi %s1330_s23, %s293_s23  }
  0x67   : >> { %s295_s28 = scalar_lea.vmem %s1497_s8, %s992_s24 [#allocation3]  ;;  %s293_s23 = sadd.s32 1, %s1332_s23  }
  0x68   : >> { %v296_v1 = vld [vmem:[%s295_s28] sm:$0xff]  ;;  %v297_v2 = vld [vmem:[%s295_s28 + $0x8] sm:$0xff]  ;;  %s918_s29 = scalar_lea.vmem [#allocation2], %s917_s26  ;;  %p290_p3 = scmp.ge.s32.totalorder %s293_s23, 16  }
  0x69   : >> { %993 = vst.msk [vmem:[%s918_s29 + $0x19] sm:$0xff] %vm232_vm0, %v296_v1  ;;  %994 = vst.msk [vmem:[%s918_s29 + $0x21] sm:$0xff] %vm232_vm0, %v297_v2  ;;  %s1568_s12 = smov (%p290_p3), 0  }
  0x6a   : > { %292 = sbr.rel (!%p290_p3) target bundleno = 102 (0x66), region = 113 }
  0x6f LB: >> { %v1189_v3 = vld [vmem:[#allocation6 + $0x8] sm:$0xff]   ;;  %v1345_v4 = vmov 0.0   ;;  %v1190_v5 = vld [vmem:[#allocation6] sm:$0xff]   ;;  %vm1346_vm2 = vmmov 0   ;;  %s309_s11 = smul.u32 24, %s1336_s12  ;;  %v1191_v6 = vld [vmem:[#allocation6 + $0x10] sm:$0xff]   ;;  %s1336_s12 = sphi %s1568_s12, %s308_s12  }
  0x70   : >> { %1053 = vmatprep.subr.bf16.mxu0 %v1345_v4  ;;  %1059 = vmatprep.subr.bf16.mxu1 %v1345_v4  ;;  %v1192_v12 = vld [vmem:[#allocation6 + $0x18] sm:$0xff]   ;;  %v1193_v20 = vld [vmem:[#allocation6 + $0x20] sm:$0xff]   ;;  %v1194_v21 = vld [vmem:[#allocation6 + $0x28] sm:$0xff]   ;;  %s1027_s6 = sshll.u32 %s1336_s12, 4  ;;  %vm856_vm3 = vcmask 523264   ;;  %s308_s12 = sadd.s32 1, %s1336_s12  }
  0x71   : >> { %1054 = vmatpush3.bf16.msra.mxu0 %v1189_v3  ;;  %1055 = vmatprep.mubr.msk.bf16.mxu0 %vm1346_vm2, %v1345_v4  ;;  %s1582_s13 = scalar_lea.vmem [#allocation2], %s309_s11  ;;  %v1195_v28 = vld [vmem:[#allocation6 + $0x30] sm:$0xff]   ;;  %v1196_v29 = vld [vmem:[#allocation6 + $0x38] sm:$0xff]   ;;  %v1197_v36 = vld [vmem:[#allocation6 + $0x40] sm:$0xff]   ;;  %s855_s7 = scalar_lea.vmem %s1563_s21, %s1027_s6 [#allocation8] }
  0x72   : >> { %1060 = vmatpush3.bf16.msra.mxu1 %v1190_v5  ;;  %1061 = vmatprep.mubr.msk.bf16.mxu1 %vm1346_vm2, %v1345_v4  ;;  %v316_v7 = vld [vmem:[%s1582_s13 + $0x1] sm:$0xff]  ;;  %v317_v8 = vld [vmem:[%s1582_s13 + $0x9] sm:$0xff]  ;;  %v1001_v16 = vld [vmem:[%s1582_s13 + $0x18] sm:$0xff]  ;;  %p305_p11 = scmp.ge.s32.totalorder %s308_s12, 16  }
  0x73   : >> { %1065 = vmatprep.subr.bf16.mxu0 %v1345_v4  ;;  %1071 = vmatprep.subr.bf16.mxu1 %v1345_v4  ;;  %v311_v9 = vld [vmem:[%s1582_s13] sm:$0xff]  ;;  %v318_v10 = vpack.c.bf16 %v317_v8, %v316_v7  ;;  %v312_v11 = vld [vmem:[%s1582_s13 + $0x8] sm:$0xff]  ;;  %v1013_v30 = vld [vmem:[%s1582_s13 + $0x30] sm:$0xff]  ;;  %s1034_s8 = sshll.u32 (%p305_p11), %s1396_s19, 12  ;;  %s873_s28 = sshll.u32 (%p305_p11), %s1563_s21, 4  ;;  %s1648_s28 = int_to_ptr.vmem [resolvable:$true] %s873_s28 }
  0x74   : >> { %v313_v13 = vpack.c.bf16 %v312_v11, %v311_v9  ;;  %v422_v14 = vld [vmem:[%s1582_s13 + $0x2] sm:$0xff]  ;;  %v423_v15 = vld [vmem:[%s1582_s13 + $0xa] sm:$0xff]  ;;  %v1005_v22 = vld [vmem:[%s1582_s13 + $0x19] sm:$0xff]  ;;  %s1645_s26 = scalar_lea.hbm (%p305_p11), %s1695_s4, %s1034_s8  ;;  %s860_s29 = scalar_lea.sflag (%p305_p11), [#allocation5], %s1491_s5 }
  0x75   : >> { %1056 = vmatmul.mubr.msk.bf16.vlgmr.msra.gmra.mxu0 %vm232_vm0, %v318_v10  ;;  %v1002_v17 = vld [vmem:[%s1582_s13 + $0x20] sm:$0xff]  ;;  %v424_v18 = vpack.c.bf16 %v423_v15, %v422_v14  ;;  %v1014_v31 = vld [vmem:[%s1582_s13 + $0x38] sm:$0xff]  ;;  %s1252_s11 = scalar_lea.vmem (%p305_p11), %s1648_s28, 4096  ;;  %p1711_p12 = scmp.ne.s32.totalorder (%p305_p11), %s1705_s10, 0 }
  0x76   : >> { %1062 = vmatmul.mubr.msk.bf16.vlgmr.msra.gmra.mxu1 %vm232_vm0, %v313_v13  ;;  %1066 = vmatpush3.bf16.msra.mxu0 %v1191_v6  ;;  %v485_v19 = vpack.c.bf16 %v1002_v17, %v1001_v16  ;;  %v1006_v23 = vld [vmem:[%s1582_s13 + $0x21] sm:$0xff]  ;;  %v1017_v32 = vld [vmem:[%s1582_s13 + $0x31] sm:$0xff]  ;;  %v1018_v33 = vld [vmem:[%s1582_s13 + $0x39] sm:$0xff]  ;;  %v662_v34 = vpack.c.bf16 %v1014_v31, %v1013_v30  ;;  %p1253_p7 = scmp.ne.s32.totalorder (%p305_p11), %s1648_s28, %s1252_s11  ;;  %s1347_s12 = smov (%p305_p11), [#allocation8]  }
  0x77   : >> { %1072 = vmatpush3.bf16.msra.mxu1 %v1192_v12  ;;  %1067 = vmatprep.mubr.msk.bf16.mxu0 %vm1346_vm2, %v1345_v4  ;;  %v1009_v24 = vld [vmem:[%s1582_s13 + $0x1a] sm:$0xff]  ;;  %v1010_v25 = vld [vmem:[%s1582_s13 + $0x22] sm:$0xff]  ;;  %v543_v26 = vpack.c.bf16 %v1006_v23, %v1005_v22  ;;  %v720_v35 = vpack.c.bf16 %v1018_v33, %v1017_v32  ;;  %v1021_v37 = vld [vmem:[%s1582_s13 + $0x32] sm:$0xff] }
  0x78   : >> { %1073 = vmatprep.mubr.msk.bf16.mxu1 %vm1346_vm2, %v1345_v4  ;;  %1077 = vmatprep.subr.bf16.mxu0 %v1345_v4  ;;  %v601_v27 = vpack.c.bf16 %v1010_v25, %v1009_v24  ;;  %v1022_v38 = vld [vmem:[%s1582_s13 + $0x3a] sm:$0xff]  ;;  %p1254_p10 = pnand (%p305_p11), %p1253_p7, %p1711_p12  ;;  %s1256_s13 = sshll.u32 (%p305_p11), %s1347_s12, 4  ;;  %s1257_s13 = int_to_ptr.vmem [resolvable:$false] %s1256_s13 }
  0x79   : >> { %1083 = vmatprep.subr.bf16.mxu1 %v1345_v4  ;;  %v778_v39 = vpack.c.bf16 %v1022_v38, %v1021_v37  ;;  %v1025_v22 = vld [vmem:[%s1693_s2] ss:$0 sm:$0xff]  ;;  %s1258_s19 = scalar_lea.vmem (%p305_p11), %s1257_s13, 8192  ;;  %p1259_p13 = scmp.lt.s32.totalorder (%p305_p11), %s1648_s28, %s1257_s13 }
  0x7a   : >> { %v1026_v24 = vld [vmem:[%s1694_s3] ss:$0 sm:$0xff]  ;;  %p1255_p2 = pneg (%p305_p11), %p1254_p10  ;;  %p1260_p0 = scmp.lt.s32.totalorder (%p305_p11), %s1258_s19, %s1252_s11 }
  0x7c   : > { %p1261_p5 = por (%p305_p11), %p1260_p0, %p1259_p13 }
  0x7d   : >> { %1068 = vmatmul.mubr.msk.bf16.vlgmr.msra.gmra.mxu0 %vm232_vm0, %v424_v18 }
  0x7e   : >> { %1074 = vmatmul.mubr.msk.bf16.vlgmr.msra.gmra.mxu1 %vm232_vm0, %v485_v19  ;;  %1078 = vmatpush3.bf16.msra.mxu0 %v1193_v20  ;;  %p1262_p9 = pnand (%p305_p11), %p1261_p5, %p1255_p2 }
  0x7f   : >> { %1084 = vmatpush3.bf16.msra.mxu1 %v1194_v21  ;;  %1079 = vmatprep.mubr.msk.bf16.mxu0 %vm1346_vm2, %v1345_v4 }
  0x80   : >> { %1085 = vmatprep.mubr.msk.bf16.mxu1 %vm1346_vm2, %v1345_v4  ;;  %1089 = vmatprep.subr.bf16.mxu0 %v1345_v4 }
  0x81   : >> { %1095 = vmatprep.subr.bf16.mxu1 %v1345_v4 }
  0x85   : >> { %1080 = vmatmul.mubr.msk.bf16.vlgmr.msra.gmra.mxu0 %vm232_vm0, %v543_v26 }
  0x86   : >> { %1086 = vmatmul.mubr.msk.bf16.vlgmr.msra.gmra.mxu1 %vm232_vm0, %v601_v27  ;;  %1090 = vmatpush3.bf16.msra.mxu0 %v1195_v28 }
  0x87   : >> { %1096 = vmatpush3.bf16.msra.mxu1 %v1196_v29  ;;  %1091 = vmatprep.mubr.msk.bf16.mxu0 %vm1346_vm2, %v1345_v4 }
  0x88   : >> { %1097 = vmatprep.mubr.msk.bf16.mxu1 %vm1346_vm2, %v1345_v4  ;;  %1101 = vmatprep.subr.bf16.mxu0 %v1345_v4 }
  0x8d   : >> { %1092 = vmatmul.mubr.msk.bf16.vlgmr.msra.gmra.mxu0 %vm232_vm0, %v662_v34 }
  0x8e   : >> { %1098 = vmatmul.mubr.msk.bf16.vlgmr.msra.gmra.mxu1 %vm232_vm0, %v720_v35  ;;  %1102 = vmatpush3.bf16.msra.mxu0 %v1197_v36 }
  0x8f   : >> { %1103 = vmatprep.mubr.msk.bf16.mxu0 %vm1346_vm2, %v1345_v4 }
  0x95   : >> { %1104 = vmatmul.mubr.msk.bf16.vlgmr.msra.gmra.mxu0 %vm232_vm0, %v778_v39 }
 0x135   : >> { %v365_v40 = vpop.f32.mrf.mxu0 }
 0x136   : >> { %v415_v41 = vpop.f32.mrf.mxu1 }
 0x137   : >> { %v1057_v42 = vpop.f32.mrf.mxu0  ;;  %v416_v53 = vadd.f32 %v415_v41, %v365_v40 }
 0x138   : >> { %v1063_v43 = vpop.f32.mrf.mxu1 }
 0x139   : >> { %v368_v44 = vpop.f32.mrf.mxu0 }
 0x13a   : >> { %v418_v45 = vpop.f32.mrf.mxu1 }
 0x13b   : >> { %v1058_v46 = vpop.f32.mrf.mxu0  ;;  %v419_v59 = vadd.f32 %v418_v45, %v368_v44 }
 0x13c   : >> { %v1064_v47 = vpop.f32.mrf.mxu1 }
 0x13d   : >> { %v471_v48 = vpop.f32.mrf.mxu0 }
 0x13e   : >> { %v532_v49 = vpop.f32.mrf.mxu1  ;;  %v478_v56 = vadd.f32 %v471_v48, %v416_v53 }
 0x13f   : >> { %v1069_v50 = vpop.f32.mrf.mxu0 }
 0x140   : >> { %v1075_v51 = vpop.f32.mrf.mxu1  ;;  %v539_v62 = vadd.f32 %v532_v49, %v478_v56 }
 0x141   : >> { %v474_v52 = vpop.f32.mrf.mxu0 }
 0x142   : >> { %v535_v54 = vpop.f32.mrf.mxu1  ;;  %v479_v63 = vadd.f32 %v474_v52, %v419_v59 }
 0x143   : >> { %v1070_v55 = vpop.f32.mrf.mxu0 }
 0x144   : >> { %v1076_v57 = vpop.f32.mrf.mxu1  ;;  %v540_v5 = vadd.f32 %v535_v54, %v479_v63 }
 0x145   : >> { %v590_v58 = vpop.f32.mrf.mxu0 }
 0x146   : >> { %v648_v60 = vpop.f32.mrf.mxu1  ;;  %v597_v2 = vadd.f32 %v590_v58, %v539_v62 }
 0x147   : >> { %v1081_v61 = vpop.f32.mrf.mxu0 }
 0x148   : >> { %v1087_v0 = vpop.f32.mrf.mxu1  ;;  %v655_v8 = vadd.f32 %v648_v60, %v597_v2 }
 0x149   : >> { %v593_v1 = vpop.f32.mrf.mxu0 }
 0x14a   : >> { %v651_v3 = vpop.f32.mrf.mxu1  ;;  %v598_v9 = vadd.f32 %v593_v1, %v540_v5 }
 0x14b   : >> { %v1082_v4 = vpop.f32.mrf.mxu0 }
 0x14c   : >> { %v1088_v6 = vpop.f32.mrf.mxu1  ;;  %v656_v15 = vadd.f32 %v651_v3, %v598_v9 }
 0x14d   : >> { %v709_v7 = vpop.f32.mrf.mxu0 }
 0x14e   : >> { %v767_v10 = vpop.f32.mrf.mxu1  ;;  %v716_v12 = vadd.f32 %v709_v7, %v655_v8 }
 0x14f   : >> { %v1093_v11 = vpop.f32.mrf.mxu0 }
 0x150   : >> { %v1099_v13 = vpop.f32.mrf.mxu1  ;;  %v774_v18 = vadd.f32 %v767_v10, %v716_v12 }
 0x151   : >> { %v712_v14 = vpop.f32.mrf.mxu0 }
 0x152   : >> { %v770_v16 = vpop.f32.mrf.mxu1  ;;  %v717_v19 = vadd.f32 %v712_v14, %v656_v15 }
 0x153   : >> { %v1094_v17 = vpop.f32.mrf.mxu0 }
 0x154   : >> { %v1100_v20 = vpop.f32.mrf.mxu1  ;;  %v775_v26 = vadd.f32 %v770_v16, %v717_v19 }
 0x155   : >> { %v825_v21 = vpop.f32.mrf.mxu0 }
 0x156   : >> { %v832_v23 = vadd.f32 %v825_v21, %v774_v18 }
 0x157   : >> { %v1105_v25 = vpop.f32.mrf.mxu0 }
 0x158   : >> { %v841_v27 = vmul.f32 %v1025_v22, %v832_v23 }
 0x159   : >> { %v828_v28 = vpop.f32.mrf.mxu0 }
 0x15a   : >> { %v850_v29 = vadd.f32 %v1026_v24, %v841_v27  ;;  %v833_v30 = vadd.f32 %v828_v28, %v775_v26 }
 0x15b   : >> { %v1106_v31 = vpop.f32.mrf.mxu0 }
 0x15c   : >> { %v852_v32 = vmax.f32 %v850_v29, 0.0  ;;  %v842_v33 = vmul.f32 %v1025_v22, %v833_v30 }
 0x15e   : >> { %857 = vst.msk [vmem:[%s855_s7] sm:$0xff] %vm856_vm3, %v852_v32  ;;  %v851_v34 = vadd.f32 %v1026_v24, %v842_v33  ;;  %307 = sbr.rel (!%p305_p11) target bundleno = 111 (0x6f), region = 124 }
 0x160   : >> { %v853_v35 = vmax.f32 %v851_v34, 0.0 }
 0x162   : >> { %858 = vst.msk [vmem:[%s855_s7 + $0x8] sm:$0xff] %vm856_vm3, %v853_v35 }
 0x163   : > { %1265 = shalt.err (!%p1262_p9)
}
 0x164   : > { %s1266_s21 = scalar_lea.hbm %s1645_s26, 4096  ;;  %s1270_s25 = scalar_lea.hbm %s1695_s4, 8192 }
 0x165   : > { %p1267_p1 = scmp.ne.s32.totalorder %s1645_s26, %s1266_s21  ;;  %p1271_p8 = scmp.lt.s32.totalorder %s1645_s26, %s1695_s4 }
 0x166   : > { %p1272_p3 = scmp.lt.s32.totalorder %s1270_s25, %s1266_s21 }
 0x167   : > { %p1268_p4 = pnand %p1267_p1, %p1711_p12 }
 0x168   : > { %p1273_p11 = por %p1272_p3, %p1271_p8 }
 0x169   : > { %p1269_p6 = pneg %p1268_p4 }
 0x16b   : > { %p1274_p7 = pnand %p1273_p11, %p1269_p6 }
 0x16d   : > { %1277 = shalt.err (!%p1274_p7)
}
 0x16e   : > { %s1348_s7 = smov 128   ;;  %s1349_s8 = smov 8  }
 0x16f   : > { %1113 = dma.vmem_to_hbm [thread:$0]  (%p1711_p12), %s1648_s28, 4096, %s1645_s26, %s860_s29, %s1348_s7, %s1348_s7, %s1349_s8  }
 0x170 PF: > { %s888_s23 = sand.u32 1, %s1316_s15   ;;  %p1712_p10 = scmp.ne.s32.totalorder %s1701_s22, 0 }
 0x171   : > { %p1713_p2 = scmp.ge.s32.totalorder %s1328_s18, 2  ;;  %s889_s24 = scalar_lea.sflag [#allocation5], %s888_s23 }
 0x173   : > { %p1124_p13 = pnand %p1713_p2, %p1712_p10 }
 0x175   : > { %p1125_p0 = pneg %p1124_p13 }
 0x177   : > { %1311 = dma.done.wait (%p1125_p0), %s889_s24, 4096  }
 0x178   : > { %1313 = vsyncadd (%p1125_p0), %s889_s24, 4294963200  ;;  %p18_p5 = scmp.ge.s32.totalorder %s1429_s27, 4   ;;  %s1714_s15 = smov %s1320_s16 }
 0x179   : > { %s1715_s16 = smov %s1324_s17  ;;  %s1716_s17 = smov %s1446_s9 }
 0x17a   : > { %s1717_s18 = smov %s1429_s27  ;;  %20 = sbr.rel (!%p18_p5) target bundleno = 6 (0x6), region = 135 }
 0x17f   :  { %894 = vsyncpa [#allocation4], 1 }
 0x180   :  { %896 = vsyncpa [#allocation4 + $0x1], 1 }
 0x181   :  { %897 = vsyncpa [#allocation7], 1 }
 0x182   :  { %898 = vsyncpa [#allocation5], 1 }
 0x183   :  { %900 = vsyncpa [#allocation5 + $0x1], 1 }

</bundles_post_ra>
